<compile_context>
chip_gen: v7x
topology: tpu7x:2x2x1
jax: 0.10.0
libtpu: 0.0.40
codegen_flags: <defaults>
</compile_context>

<pallas_src>
import functools

import jax
import jax.numpy as jnp
from jax import lax
from jax.experimental import pallas as pl
from jax.experimental.pallas import tpu as pltpu


def _gumbel_subset_kernel(scores_ref, noise_ref, out_ref, *, k, tau, eps,
                          n_valid, hard):
    # scores_ref / noise_ref / out_ref: [TB, N_pad] VMEM tiles.
    f32 = jnp.float32
    s = scores_ref[...].astype(f32) + noise_ref[...].astype(f32)

    if tau == 1.0:
        # Exp-domain rewrite (mathematically identical for tau == 1):
        #   softmax(s + sum_j log(mask_j)) == normalize(exp(s) * prod_j mask_j)
        # -> a single exp per element; the mask is a pure-VALU multiply.
        m0 = jnp.max(s, axis=-1, keepdims=True)
        w = jnp.exp(s - m0)
        onehot = w * (1.0 / jnp.sum(w, axis=-1, keepdims=True))
        khot = onehot
        for _ in range(1, k):
            w = w * jnp.maximum(1.0 - onehot, f32(eps))
            # per-row rescale keeps w in [0, 1] (softmax is scale-invariant);
            # prevents underflow across the unrolled iterations.  No EUP work.
            w = w * (1.0 / jnp.max(w, axis=-1, keepdims=True))
            onehot = w * (1.0 / jnp.sum(w, axis=-1, keepdims=True))
            khot = khot + onehot
    else:
        # General tau: keep the log/exp path, but fold 1/tau into a single
        # pre-scale of the scores (and of the log-mask term).
        inv_tau = f32(1.0 / tau)
        s = s * inv_tau
        m = jnp.max(s, axis=-1, keepdims=True)
        e = jnp.exp(s - m)
        onehot = e * (1.0 / jnp.sum(e, axis=-1, keepdims=True))
        khot = onehot
        for _ in range(1, k):
            s = s + inv_tau * jnp.log(jnp.maximum(1.0 - onehot, f32(eps)))
            m = jnp.max(s, axis=-1, keepdims=True)
            e = jnp.exp(s - m)
            onehot = e * (1.0 / jnp.sum(e, axis=-1, keepdims=True))
            khot = khot + onehot

    if not hard:
        out_ref[...] = khot.astype(out_ref.dtype)
        return

    # Fused hard top-k (straight-through forward value): k unrolled argmax
    # passes over khot -- only XLU reductions + VALU selects, no EUP work.
    col = lax.broadcasted_iota(jnp.int32, khot.shape, dimension=1)
    work = jnp.where(col < n_valid, khot, f32(-1.0))   # mask padded lanes
    khot_hard = jnp.zeros_like(khot)
    n_total = jnp.int32(khot.shape[-1])
    for _ in range(k):
        row_max = jnp.max(work, axis=-1, keepdims=True)
        first = jnp.min(jnp.where(work >= row_max, col, n_total),
                        axis=-1, keepdims=True)          # first-index tiebreak
        sel = col == first
        khot_hard = jnp.where(sel, f32(1.0), khot_hard)
        work = jnp.where(sel, f32(-2.0), work)            # suppress the winner
    # Straight-through forward value: hard - detach(soft) + soft.
    out_ref[...] = (khot_hard - khot + khot).astype(out_ref.dtype)


def gumbel_subset(scores, key, *, k, tau=1.0, eps=1e-10, hard=False):
    """Pallas implementation of GumbelSubsetOperator.forward.

    scores: [B, N] float array (softmax over the last axis, as in the module).
    Returns the [B, N] relaxed k-hot vector (or its hard straight-through
    forward value when hard=True).
    """
    B, N = scores.shape
    orig_dtype = scores.dtype

    # Gumbel(0, 1) noise generated host/XLA-side (portable: no TPU-only PRNG
    # primitives inside the kernel).
    g = jax.random.gumbel(key, (B, N), dtype=jnp.float32)

    # Lane-dense padding of N (multiple of 128); padded lanes carry -1e30
    # scores (+0 noise) so their softmax contribution is exactly 0.
    n_pad = ((N + 127) // 128) * 128

    # Batch tile: ~1 MiB f32 per (tb, n_pad) tile.  With 2 double-buffered
    # inputs, 1 double-buffered output and ~5-6 live f32 intermediates in the
    # unrolled k-loop, the per-step footprint is ~10-14x the tile -> well
    # inside a 32 MiB scoped-VMEM budget on v5e/v6e/v7x.
    budget_elems = (1 << 20) // 4
    tb = max(8, min(512, (budget_elems // n_pad) // 8 * 8))
    b_pad8 = ((B + 7) // 8) * 8
    if b_pad8 >= 16:
        # Guarantee >= 2 grid steps so the "parallel" axis can be sharded
        # across v7x's two TensorCores.
        tb = min(tb, max(8, (b_pad8 // 2) // 8 * 8))
    else:
        tb = min(tb, b_pad8)
    b_pad = ((B + tb - 1) // tb) * tb

    if (b_pad, n_pad) != (B, N):
        scores_p = jnp.pad(scores, ((0, b_pad - B), (0, n_pad - N)),
                           constant_values=-1e30)
        noise_p = jnp.pad(g, ((0, b_pad - B), (0, n_pad - N)),
                          constant_values=0.0)
    else:
        scores_p, noise_p = scores, g

    kernel = functools.partial(
        _gumbel_subset_kernel, k=int(k), tau=float(tau), eps=float(eps),
        n_valid=N, hard=bool(hard))

    out = pl.pallas_call(
        kernel,
        out_shape=jax.ShapeDtypeStruct((b_pad, n_pad), orig_dtype),
        grid=(b_pad // tb,),
        in_specs=[pl.BlockSpec((tb, n_pad), lambda i: (i, 0)),
                  pl.BlockSpec((tb, n_pad), lambda i: (i, 0))],
        out_specs=pl.BlockSpec((tb, n_pad), lambda i: (i, 0)),
        compiler_params=pltpu.CompilerParams(
            dimension_semantics=("parallel",),
            vmem_limit_bytes=32 * 1024 * 1024,
        ),
    )(scores_p, noise_p)

    # TODO(synk): add a custom_vjp on the pallas_call if straight-through
    # gradients through the hard=True path are required; forward values match.
    return out[:B, :N]


if __name__ == "__main__":
    key = jax.random.PRNGKey(0)
    k1, k2, k3, k4, k5, k6 = jax.random.split(key, 6)

    K_SUBSET = 4

    # Case 1: lane-aligned shape, soft relaxation (tau == 1 exp-domain path).
    B, N = 16, 256
    scores = jax.random.normal(k1, (B, N), dtype=jnp.float32)
    out = gumbel_subset(scores, k2, k=K_SUBSET, tau=1.0, eps=1e-10, hard=False)
    out = jax.block_until_ready(out)
    assert out.shape == (B, N)
    assert out.dtype == jnp.float32
    # each of the k softmax passes sums to 1 per row -> rows sum to ~k
    row_sums = jnp.sum(out, axis=1)
    assert jnp.allclose(row_sums, K_SUBSET, atol=1e-2), row_sums
    assert bool(jnp.all(out >= 0.0))

    # Case 2: ragged shape (exercises B/N padding) + fused hard path.
    B2, N2 = 5, 200
    scores2 = jax.random.normal(k3, (B2, N2), dtype=jnp.float32)
    out_hard = gumbel_subset(scores2, k4, k=K_SUBSET, tau=1.0, eps=1e-10,
                             hard=True)
    out_hard = jax.block_until_ready(out_hard)
    assert out_hard.shape == (B2, N2)
    hard_sums = jnp.sum(out_hard, axis=1)
    assert jnp.allclose(hard_sums, K_SUBSET, atol=1e-2), hard_sums
    n_ones = jnp.sum(jnp.round(out_hard) == 1.0, axis=1)
    assert bool(jnp.all(n_ones == K_SUBSET)), n_ones

    # Case 3: general-tau (log/exp) path.
    B3, N3 = 6, 160
    scores3 = jax.random.normal(k5, (B3, N3), dtype=jnp.float32)
    out_tau = gumbel_subset(scores3, k6, k=3, tau=0.5, eps=1e-10, hard=False)
    out_tau = jax.block_until_ready(out_tau)
    assert out_tau.shape == (B3, N3)
    assert jnp.allclose(jnp.sum(out_tau, axis=1), 3.0, atol=1e-2)

    print("KERNEL_OK")
</pallas_src>

<mosaic_0001>
module attributes {stable_mosaic.version = 11 : i64} {
  func.func @_gumbel_subset_kernel(%arg0: i32, %arg1: memref<8x256xf32, #tpu.memory_space<vmem>>, %arg2: memref<8x256xf32, #tpu.memory_space<vmem>>, %arg3: memref<8x256xf32, #tpu.memory_space<vmem>>) attributes {dimension_semantics = [#tpu.dimension_semantics<parallel>], iteration_bounds = array<i64: 2>, scalar_prefetch = 0 : i64, scratch_operands = 0 : i64, tpu.core_type = #tpu.core_type<tc>, window_params = [{transform_indices = @transform_0, window_bounds = array<i64: 8, 256>}, {transform_indices = @transform_1, window_bounds = array<i64: 8, 256>}, {transform_indices = @transform_2, window_bounds = array<i64: 8, 256>}]} {
    %c0 = arith.constant 0 : index
    %c0_0 = arith.constant 0 : index
    %0 = vector.load %arg1[%c0, %c0_0] : memref<8x256xf32, #tpu.memory_space<vmem>>, vector<8x256xf32>
    %c0_1 = arith.constant 0 : index
    %c0_2 = arith.constant 0 : index
    %1 = vector.load %arg2[%c0_1, %c0_2] : memref<8x256xf32, #tpu.memory_space<vmem>>, vector<8x256xf32>
    %2 = arith.addf %0, %1 : vector<8x256xf32>
    %cst = arith.constant dense<0xFF800000> : vector<8xf32>
    %3 = vector.multi_reduction <maximumf>, %2, %cst [1] : vector<8x256xf32> to vector<8xf32>
    %4 = vector.shape_cast %3 : vector<8xf32> to vector<8x1xf32>
    %5 = vector.broadcast %4 : vector<8x1xf32> to vector<8x256xf32>
    %6 = arith.subf %2, %5 : vector<8x256xf32>
    %7 = math.exp %6 : vector<8x256xf32>
    %cst_3 = arith.constant dense<0.000000e+00> : vector<8xf32>
    %8 = vector.multi_reduction <add>, %7, %cst_3 [1] : vector<8x256xf32> to vector<8xf32>
    %9 = vector.shape_cast %8 : vector<8xf32> to vector<8x1xf32>
    %cst_4 = arith.constant 1.000000e+00 : f32
    %10 = vector.broadcast %cst_4 : f32 to vector<8x1xf32>
    %11 = arith.divf %10, %9 : vector<8x1xf32>
    %12 = vector.broadcast %11 : vector<8x1xf32> to vector<8x256xf32>
    %13 = arith.mulf %7, %12 : vector<8x256xf32>
    %cst_5 = arith.constant 1.000000e+00 : f32
    %14 = vector.broadcast %cst_5 : f32 to vector<8x256xf32>
    %15 = arith.subf %14, %13 : vector<8x256xf32>
    %cst_6 = arith.constant 1.000000e-10 : f32
    %16 = vector.broadcast %cst_6 : f32 to vector<8x256xf32>
    %17 = arith.maximumf %15, %16 : vector<8x256xf32>
    %18 = arith.mulf %7, %17 : vector<8x256xf32>
    %cst_7 = arith.constant dense<0xFF800000> : vector<8xf32>
    %19 = vector.multi_reduction <maximumf>, %18, %cst_7 [1] : vector<8x256xf32> to vector<8xf32>
    %20 = vector.shape_cast %19 : vector<8xf32> to vector<8x1xf32>
    %cst_8 = arith.constant 1.000000e+00 : f32
    %21 = vector.broadcast %cst_8 : f32 to vector<8x1xf32>
    %22 = arith.divf %21, %20 : vector<8x1xf32>
    %23 = vector.broadcast %22 : vector<8x1xf32> to vector<8x256xf32>
    %24 = arith.mulf %18, %23 : vector<8x256xf32>
    %cst_9 = arith.constant dense<0.000000e+00> : vector<8xf32>
    %25 = vector.multi_reduction <add>, %24, %cst_9 [1] : vector<8x256xf32> to vector<8xf32>
    %26 = vector.shape_cast %25 : vector<8xf32> to vector<8x1xf32>
    %cst_10 = arith.constant 1.000000e+00 : f32
    %27 = vector.broadcast %cst_10 : f32 to vector<8x1xf32>
    %28 = arith.divf %27, %26 : vector<8x1xf32>
    %29 = vector.broadcast %28 : vector<8x1xf32> to vector<8x256xf32>
    %30 = arith.mulf %24, %29 : vector<8x256xf32>
    %31 = arith.addf %13, %30 : vector<8x256xf32>
    %cst_11 = arith.constant 1.000000e+00 : f32
    %32 = vector.broadcast %cst_11 : f32 to vector<8x256xf32>
    %33 = arith.subf %32, %30 : vector<8x256xf32>
    %cst_12 = arith.constant 1.000000e-10 : f32
    %34 = vector.broadcast %cst_12 : f32 to vector<8x256xf32>
    %35 = arith.maximumf %33, %34 : vector<8x256xf32>
    %36 = arith.mulf %24, %35 : vector<8x256xf32>
    %cst_13 = arith.constant dense<0xFF800000> : vector<8xf32>
    %37 = vector.multi_reduction <maximumf>, %36, %cst_13 [1] : vector<8x256xf32> to vector<8xf32>
    %38 = vector.shape_cast %37 : vector<8xf32> to vector<8x1xf32>
    %cst_14 = arith.constant 1.000000e+00 : f32
    %39 = vector.broadcast %cst_14 : f32 to vector<8x1xf32>
    %40 = arith.divf %39, %38 : vector<8x1xf32>
    %41 = vector.broadcast %40 : vector<8x1xf32> to vector<8x256xf32>
    %42 = arith.mulf %36, %41 : vector<8x256xf32>
    %cst_15 = arith.constant dense<0.000000e+00> : vector<8xf32>
    %43 = vector.multi_reduction <add>, %42, %cst_15 [1] : vector<8x256xf32> to vector<8xf32>
    %44 = vector.shape_cast %43 : vector<8xf32> to vector<8x1xf32>
    %cst_16 = arith.constant 1.000000e+00 : f32
    %45 = vector.broadcast %cst_16 : f32 to vector<8x1xf32>
    %46 = arith.divf %45, %44 : vector<8x1xf32>
    %47 = vector.broadcast %46 : vector<8x1xf32> to vector<8x256xf32>
    %48 = arith.mulf %42, %47 : vector<8x256xf32>
    %49 = arith.addf %31, %48 : vector<8x256xf32>
    %cst_17 = arith.constant 1.000000e+00 : f32
    %50 = vector.broadcast %cst_17 : f32 to vector<8x256xf32>
    %51 = arith.subf %50, %48 : vector<8x256xf32>
    %cst_18 = arith.constant 1.000000e-10 : f32
    %52 = vector.broadcast %cst_18 : f32 to vector<8x256xf32>
    %53 = arith.maximumf %51, %52 : vector<8x256xf32>
    %54 = arith.mulf %42, %53 : vector<8x256xf32>
    %cst_19 = arith.constant dense<0xFF800000> : vector<8xf32>
    %55 = vector.multi_reduction <maximumf>, %54, %cst_19 [1] : vector<8x256xf32> to vector<8xf32>
    %56 = vector.shape_cast %55 : vector<8xf32> to vector<8x1xf32>
    %cst_20 = arith.constant 1.000000e+00 : f32
    %57 = vector.broadcast %cst_20 : f32 to vector<8x1xf32>
    %58 = arith.divf %57, %56 : vector<8x1xf32>
    %59 = vector.broadcast %58 : vector<8x1xf32> to vector<8x256xf32>
    %60 = arith.mulf %54, %59 : vector<8x256xf32>
    %cst_21 = arith.constant dense<0.000000e+00> : vector<8xf32>
    %61 = vector.multi_reduction <add>, %60, %cst_21 [1] : vector<8x256xf32> to vector<8xf32>
    %62 = vector.shape_cast %61 : vector<8xf32> to vector<8x1xf32>
    %cst_22 = arith.constant 1.000000e+00 : f32
    %63 = vector.broadcast %cst_22 : f32 to vector<8x1xf32>
    %64 = arith.divf %63, %62 : vector<8x1xf32>
    %65 = vector.broadcast %64 : vector<8x1xf32> to vector<8x256xf32>
    %66 = arith.mulf %60, %65 : vector<8x256xf32>
    %67 = arith.addf %49, %66 : vector<8x256xf32>
    %c0_23 = arith.constant 0 : index
    %c0_24 = arith.constant 0 : index
    %68 = vector.load %arg3[%c0_23, %c0_24] : memref<8x256xf32, #tpu.memory_space<vmem>>, vector<8x256xf32>
    tpu.vector_store %arg3[%c0_23, %c0_24], %67 {strides = array<i32>} : memref<8x256xf32, #tpu.memory_space<vmem>>, vector<8x256xf32>,
    return
  }
  func.func @transform_0(%arg0: i32) -> (i32, i32) {
    %c0_i32 = arith.constant 0 : i32
    %c0_i32_0 = arith.constant 0 : i32
    return %arg0, %c0_i32 : i32, i32
  }
  func.func @transform_1(%arg0: i32) -> (i32, i32) {
    %c0_i32 = arith.constant 0 : i32
    %c0_i32_0 = arith.constant 0 : i32
    return %arg0, %c0_i32 : i32, i32
  }
  func.func @transform_2(%arg0: i32) -> (i32, i32) {
    %c0_i32 = arith.constant 0 : i32
    %c0_i32_0 = arith.constant 0 : i32
    return %arg0, %c0_i32 : i32, i32
  }
}

</mosaic_0001>

<bundles_post_ra>
// kernel: tpu_custom_call.1
= control target key start
LH: loop header
LB: loop body
LE: loop exit
PB: predicated region body
PF: predicated region fallthrough
CT: control target
= control target key end

     0   :  { %7 = vsyncpa [#allocation3], 0  ;;  %s850_s0 = inlined_call_operand.hbm [shape: f32[16,256], index: 0, kind: input, shape index: {}]   ;;  %s851_s1 = inlined_call_operand.hbm [shape: f32[16,256], index: 1, kind: input, shape index: {}]   ;;  %s852_s2 = inlined_call_operand.hbm [shape: f32[16,256], index: 2, kind: output, shape index: {}]  }
   0x1   :  { %9 = vsyncpa [#allocation3 + $0x1], 0 }
   0x2   :  { %10 = vsyncpa [#allocation6], 0 }
   0x3   :  { %12 = vsyncpa [#allocation6 + $0x1], 0 }
   0x4   :  { %13 = vsyncpa [#allocation4], 0 }
   0x5   :  { %15 = vsyncpa [#allocation4 + $0x1], 0  ;;  %s636_s9 = smov 0   ;;  %s638_s10 = smov 0  }
   0x6   :  { %s640_s11 = smov 0   ;;  %s642_s12 = smov 0  }
   0x7 LB: > { %s657_s13 = sadd.s32 4294967295, %s616_s12   ;;  %s396_s14 = sadd.s32 4294967294, %s616_s12   ;;  %s616_s12 = sphi %s642_s12, %s871_s12   ;;  %s612_s11 = sphi %s640_s11, %s870_s11   ;;  %s608_s10 = sphi %s638_s10, %s869_s10   ;;  %s604_s9 = sphi %s636_s9, %s868_s9  }
   0x8   : > { %s661_s15 = sadd.s32 1, %s616_s12   ;;  %s28_s16 = sadd.s32 1, %s612_s11 }
   0x9   : > { %s25_s17 = ssub.s32 %s616_s12, %s661_s15  ;;  %p35_p0 = scmp.ne.s32.totalorder %s612_s11, %s608_s10 }
   0xa   : > { %p26_p1 = scmp.eq.s32.totalorder %s25_s17, 0  ;;  %p36_p2 = scmp.eq.s32.totalorder %s616_s12, 0 }
   0xb   : > { %p41_p3 = scmp.ne.s32.totalorder %s608_s10, %s604_s9  ;;  %p42_p4 = scmp.eq.s32.totalorder %s657_s13, 0 }
   0xc   : > { %s673_s18 = scalar_select %p26_p1, %s612_s11, %s28_s16  }
   0xd   : > { %p675_p5 = por %p36_p2, %p35_p0  ;;  %p679_p6 = por %p42_p4, %p41_p3 }
   0xe   : > { %p91_p7 = scmp.eq.s32.totalorder %s657_s13, 1  ;;  %p97_p8 = scmp.eq.s32.totalorder %s396_s14, 1 }
   0xf   : > { %s856_s20 = scalar_select %p679_p6, 1, 0 }
  0x10   : > { %p434_p10 = scmp.lt.s32.totalorder %s616_s12, 2  ;;  %p686_p11 = por %p91_p7, %p35_p0 }
  0x11   : > { %p690_p12 = por %p97_p8, %p41_p3  ;;  %s695_s23 = sand.u32 1, %s612_s11  }
  0x12   : > { %s857_s21 = scalar_select %p686_p11, 1, 0 }
  0x13   : > { %s858_s22 = scalar_select %p690_p12, 1, 0 }
  0x14   : > { %s414_s24 = sshll.u32 %s616_s12, 8  ;;  %s399_s25 = sshll.u32 %s695_s23, 4 }
  0x15   : > { %s704_s28 = scalar_lea.hbm %s850_s0, %s414_s24  ;;  %s121_s29 = scalar_lea.vmem [#allocation2], %s399_s25 }
  0x16   : > { %s129_s30 = sshll.u32 %s121_s29, 4  ;;  %p710_p13 = pnand %p434_p10, %p675_p5  ;;  %s714_s30 = int_to_ptr.vmem [resolvable:$true] %s129_s30 }
  0x17   : > { %s118_s4 = scalar_lea.sflag [#allocation3], %s695_s23  ;;  %s486_s5 = scalar_lea.hbm %s704_s28, 256 }
  0x18   : > { %p487_p2 = scmp.ne.s32.totalorder %s704_s28, %s486_s5  ;;  %p488_p3 = pneg %p710_p13 }
  0x19   : > { %s491_s8 = scalar_lea.hbm %s850_s0, 512  ;;  %p492_p5 = scmp.lt.u32.totalorder %s704_s28, %s850_s0 }
  0x1a   : > { %p489_p4 = pnand %p488_p3, %p487_p2  ;;  %p493_p8 = scmp.lt.u32.totalorder %s491_s8, %s486_s5 }
  0x1b   : > { %p495_p9 = scmp.lt.u32.totalorder %s486_s5, %s704_s28 }
  0x1c   : > { %p490_p7 = pneg %p489_p4  ;;  %p494_p10 = por %p493_p8, %p492_p5 }
  0x1e   : > { %p496_p0 = por %p495_p9, %p494_p10 }
  0x20   : > { %p497_p1 = pnand %p496_p0, %p490_p7 }
  0x22   : > { %500 = shalt.err (!%p497_p1)
}
  0x23   : > { %s501_s17 = scalar_lea.vmem %s714_s30, 256  ;;  %s618_s19 = smov [#allocation2]  }
  0x24   : > { %p502_p2 = scmp.ne.s32.totalorder %s714_s30, %s501_s17  ;;  %s506_s26 = sshll.u32 %s618_s19, 4  ;;  %s507_s26 = int_to_ptr.vmem [resolvable:$false] %s506_s26 }
  0x25   : > { %s508_s27 = scalar_lea.vmem %s507_s26, 512  ;;  %p509_p11 = scmp.lt.s32.totalorder %s714_s30, %s507_s26 }
  0x26   : > { %p504_p4 = pnand %p502_p2, %p488_p3  ;;  %p510_p5 = scmp.lt.s32.totalorder %s508_s27, %s501_s17 }
  0x28   : > { %p505_p12 = pneg %p504_p4  ;;  %p511_p8 = por %p510_p5, %p509_p11 }
  0x2a   : > { %p512_p9 = pnand %p511_p8, %p505_p12 }
  0x2c   : > { %515 = shalt.err (!%p512_p9)
}
  0x2d   : > { %426 = dma.hbm_to_vmem [thread:$0]  (!%p710_p13), %s704_s28, 256, %s714_s30, %s118_s4  }
  0x2e   : > { %p860_p0 = scmp.lt.s32.totalorder %s616_s12, 3  ;;  %p861_p1 = scmp.ge.s32.totalorder %s616_s12, 1 }
  0x2f   : > { %s757_s7 = scalar_lea.hbm %s851_s1, %s414_s24  ;;  %s140_s8 = scalar_lea.vmem [#allocation5], %s399_s25 }
  0x30   : > { %p748_p7 = pnand %p861_p1, %p860_p0  ;;  %s148_s14 = sshll.u32 %s140_s8, 4  ;;  %s149_s14 = int_to_ptr.vmem [resolvable:$true] %s148_s14 }
  0x31   : > { %s137_s28 = scalar_lea.sflag [#allocation6], %s695_s23  ;;  %s516_s30 = scalar_lea.hbm %s757_s7, 256 }
  0x32   : > { %s862_s29 = scalar_select %p748_p7, 1, 0 }
  0x33   : > { %p517_p11 = scmp.ne.s32.totalorder %s757_s7, %s516_s30  ;;  %s521_s24 = scalar_lea.hbm %s851_s1, 512 }
  0x34   : > { %p522_p2 = scmp.lt.u32.totalorder %s757_s7, %s851_s1  ;;  %p523_p4 = scmp.lt.u32.totalorder %s521_s24, %s516_s30 }
  0x35   : > { %p519_p12 = pnand %p517_p11, %p488_p3  ;;  %p525_p8 = scmp.lt.u32.totalorder %s516_s30, %s757_s7 }
  0x36   : > { %p524_p5 = por %p523_p4, %p522_p2 }
  0x37   : > { %p520_p10 = pneg %p519_p12 }
  0x38   : > { %p526_p9 = por %p525_p8, %p524_p5 }
  0x3a   : > { %p527_p0 = pnand %p526_p9, %p520_p10 }
  0x3c   : > { %530 = shalt.err (!%p527_p0)
}
  0x3d   : > { %s531_s23 = scalar_lea.vmem %s149_s14, 256  ;;  %s619_s25 = smov [#allocation5]  }
  0x3e   : > { %p532_p1 = scmp.ne.s32.totalorder %s149_s14, %s531_s23  ;;  %s536_s26 = sshll.u32 %s619_s25, 4  ;;  %s537_s26 = int_to_ptr.vmem [resolvable:$false] %s536_s26 }
  0x3f   : > { %s538_s27 = scalar_lea.vmem %s537_s26, 512  ;;  %p539_p6 = scmp.lt.s32.totalorder %s149_s14, %s537_s26 }
  0x40   : > { %p534_p11 = pnand %p532_p1, %p488_p3  ;;  %p540_p7 = scmp.lt.s32.totalorder %s538_s27, %s531_s23 }
  0x42   : > { %p535_p12 = pneg %p534_p11  ;;  %p541_p2 = por %p540_p7, %p539_p6 }
  0x44   : > { %p542_p4 = pnand %p541_p2, %p535_p12 }
  0x46   : > { %545 = shalt.err (!%p542_p4)
}
  0x47   : > { %429 = dma.hbm_to_vmem [thread:$0]  (!%p710_p13), %s757_s7, 256, %s149_s14, %s137_s28  }
  0x48   : > { %p863_p10 = scmp.ne.s32.totalorder %s862_s29, 0 }
  0x49   : > { %s784_s5 = sand.u32 (!%p863_p10), 1, %s608_s10   ;;  %p864_p6 = scmp.ne.s32.totalorder (!%p863_p10), %s856_s20, 0 }
  0x4a   : > { %157 = sbr.rel (%p863_p10) target bundleno = 1381 (0x565), region = 28  ;;  %s787_s6 = sshll.u32 (!%p863_p10), %s784_s5, 4 }
  0x4b   : > { %s160_s8 = scalar_lea.sflag (!%p863_p10), [#allocation3], %s784_s5  ;;  %s163_s30 = scalar_lea.vmem (!%p863_p10), [#allocation2], %s787_s6 }
  0x51   : > { %591 = dma.done.wait (%p864_p6), %s160_s8, 256  }
  0x52   : > { %593 = vsyncadd (%p864_p6), %s160_s8, 4294967040  ;;  %s169_s3 = scalar_lea.sflag [#allocation6], %s784_s5  ;;  %s172_s29 = scalar_lea.vmem [#allocation5], %s787_s6 }
  0x53   : > { %595 = dma.done.wait (%p864_p6), %s169_s3, 256  }
  0x54   : > { %597 = vsyncadd (%p864_p6), %s169_s3, 4294967040  ;;  %v198_v0 = vld [vmem:[%s163_s30] sm:$0xff]  ;;  %v199_v1 = vld [vmem:[%s163_s30 + $0x8] sm:$0xff]  ;;  %s416_s20 = sshll.u32 %s657_s13, 8  ;;  %s197_s7 = scalar_lea.vmem [#allocation7], %s787_s6 }
  0x55   : > { %v200_v2 = vld [vmem:[%s172_s29] sm:$0xff]  ;;  %v201_v3 = vld [vmem:[%s172_s29 + $0x8] sm:$0xff]  ;;  %s303_s14 = sshll.u32 %s197_s7, 4  ;;  %s806_s16 = scalar_lea.hbm %s852_s2, %s416_s20  ;;  %s808_s14 = int_to_ptr.vmem [resolvable:$true] %s303_s14 }
  0x56   : > { %v202_v4 = vadd.f32 %v200_v2, %v198_v0  ;;  %v203_v5 = vadd.f32 %v201_v3, %v199_v1  ;;  %s289_s24 = scalar_lea.sflag [#allocation4], %s784_s5  ;;  %s546_s13 = scalar_lea.vmem %s808_s14, 256 }
  0x57   : > { %p547_p13 = scmp.ne.s32.totalorder %s808_s14, %s546_s13  ;;  %p865_p3 = scmp.ne.s32.totalorder %s857_s21, 0 }
  0x58   : > { %v204_v6 = vmax.f32 %v202_v4, %v203_v5  ;;  %s620_s17 = smov [#allocation7]  }
  0x59   : > { %p548_p7 = pnand %p547_p13, %p865_p3  ;;  %s550_s19 = sshll.u32 %s620_s17, 4  ;;  %s551_s19 = int_to_ptr.vmem [resolvable:$false] %s550_s19 }
  0x5a   : > { %205 = vmax.xlane.f32.xlu0 %v204_v6  ;;  %s552_s23 = scalar_lea.vmem %s551_s19, 512  ;;  %p553_p8 = scmp.lt.s32.totalorder %s808_s14, %s551_s19 }
  0x5b   : > { %p549_p5 = pneg %p548_p7  ;;  %p554_p9 = scmp.lt.s32.totalorder %s552_s23, %s546_s13 }
  0x5d   : > { %p555_p0 = por %p554_p9, %p553_p8 }
  0x5f   : > { %p556_p1 = pnand %p555_p0, %p549_p5 }
  0xe7   : > { %v206_v7 = vpop.xlane.xlu0 %205 }
  0xe8   : > { %v207_v8 = vsub.f32 %v202_v4, %v206_v7  ;;  %v208_v9 = vsub.f32 %v203_v5, %v206_v7 }
  0xea   : > { %v209_v10 = vmul.f32 1.442695, %v207_v8  ;;  %v211_v11 = vmul.f32 1.442695, %v208_v9 }
  0xec   : > { %468 = vpow2.f32 %v209_v10 }
  0xed   : > { %470 = vpow2.f32 %v211_v11 }
  0xf6   : > { %v469_v12 = vpop.eup %468 }
  0xf7   : > { %v471_v13 = vpop.eup %470 }
  0xf8   : > { %v213_v14 = vadd.f32 %v471_v13, %v469_v12 }
  0xfa   : > { %214 = vadd.xlane.f32.xlu0 %v213_v14 }
 0x187   : > { %v215_v15 = vpop.xlane.xlu0 %214 }
 0x188   : > { %472 = vrcp.f32 %v215_v15 }
 0x192   : > { %v473_v16 = vpop.eup %472 }
 0x193   : > { %v218_v17 = vmul.f32 %v473_v16, %v469_v12  ;;  %v219_v18 = vmul.f32 %v473_v16, %v471_v13 }
 0x195   : > { %v220_v19 = vsub.f32 1.0, %v218_v17  ;;  %v221_v20 = vsub.f32 1.0, %v219_v18 }
 0x197   : > { %v222_v21 = vmax.f32 %v220_v19, 1e-10  ;;  %v223_v22 = vmax.f32 %v221_v20, 1e-10 }
 0x199   : > { %v224_v23 = vmul.f32 %v469_v12, %v222_v21  ;;  %v225_v24 = vmul.f32 %v471_v13, %v223_v22 }
 0x19b   : > { %v226_v25 = vmax.f32 %v224_v23, %v225_v24 }
 0x19d   : > { %227 = vmax.xlane.f32.xlu1 %v226_v25 }
 0x22a   : > { %v228_v26 = vpop.xlane.xlu1 %227 }
 0x22b   : > { %474 = vrcp.f32 %v228_v26 }
 0x235   : > { %v475_v27 = vpop.eup %474 }
 0x236   : > { %v231_v28 = vmul.f32 %v475_v27, %v224_v23  ;;  %v232_v29 = vmul.f32 %v475_v27, %v225_v24 }
 0x238   : > { %v233_v30 = vadd.f32 %v232_v29, %v231_v28 }
 0x23a   : > { %234 = vadd.xlane.f32.xlu1 %v233_v30 }
 0x2c7   : > { %v235_v31 = vpop.xlane.xlu1 %234 }
 0x2c8   : > { %476 = vrcp.f32 %v235_v31 }
 0x2d2   : > { %v477_v32 = vpop.eup %476 }
 0x2d3   : > { %v238_v33 = vmul.f32 %v477_v32, %v231_v28  ;;  %v239_v34 = vmul.f32 %v477_v32, %v232_v29 }
 0x2d5   : > { %v242_v35 = vsub.f32 1.0, %v238_v33  ;;  %v243_v36 = vsub.f32 1.0, %v239_v34  ;;  %v241_v49 = vadd.f32 %v239_v34, %v219_v18  ;;  %v240_v50 = vadd.f32 %v238_v33, %v218_v17 }
 0x2d7   : > { %v244_v37 = vmax.f32 %v242_v35, 1e-10  ;;  %v245_v38 = vmax.f32 %v243_v36, 1e-10 }
 0x2d9   : > { %v246_v39 = vmul.f32 %v244_v37, %v231_v28  ;;  %v247_v40 = vmul.f32 %v245_v38, %v232_v29 }
 0x2db   : > { %v248_v41 = vmax.f32 %v246_v39, %v247_v40 }
 0x2dd   : > { %249 = vmax.xlane.f32.xlu0 %v248_v41 }
 0x36a   : > { %v250_v42 = vpop.xlane.xlu0 %249 }
 0x36b   : > { %478 = vrcp.f32 %v250_v42 }
 0x375   : > { %v479_v43 = vpop.eup %478 }
 0x376   : > { %v253_v44 = vmul.f32 %v479_v43, %v246_v39  ;;  %v254_v45 = vmul.f32 %v479_v43, %v247_v40 }
 0x378   : > { %v255_v46 = vadd.f32 %v254_v45, %v253_v44 }
 0x37a   : > { %256 = vadd.xlane.f32.xlu1 %v255_v46 }
 0x407   : > { %v257_v47 = vpop.xlane.xlu1 %256 }
 0x408   : > { %480 = vrcp.f32 %v257_v47 }
 0x412   : > { %v481_v48 = vpop.eup %480 }
 0x413   : > { %v260_v51 = vmul.f32 %v481_v48, %v253_v44  ;;  %v261_v52 = vmul.f32 %v481_v48, %v254_v45 }
 0x415   : > { %v263_v53 = vadd.f32 %v261_v52, %v241_v49  ;;  %v264_v54 = vsub.f32 1.0, %v260_v51  ;;  %v265_v55 = vsub.f32 1.0, %v261_v52  ;;  %v262_v56 = vadd.f32 %v260_v51, %v240_v50 }
 0x417   : > { %v266_v57 = vmax.f32 %v264_v54, 1e-10  ;;  %v267_v58 = vmax.f32 %v265_v55, 1e-10 }
 0x419   : > { %v268_v59 = vmul.f32 %v266_v57, %v253_v44  ;;  %v269_v60 = vmul.f32 %v267_v58, %v254_v45 }
 0x41b   : > { %v270_v61 = vmax.f32 %v268_v59, %v269_v60 }
 0x41d   : > { %271 = vmax.xlane.f32.xlu0 %v270_v61 }
 0x4aa   : > { %v272_v62 = vpop.xlane.xlu0 %271 }
 0x4ab   : > { %482 = vrcp.f32 %v272_v62 }
 0x4b5   : > { %v483_v63 = vpop.eup %482 }
 0x4b6   : > { %v275_v0 = vmul.f32 %v483_v63, %v268_v59  ;;  %v276_v1 = vmul.f32 %v483_v63, %v269_v60 }
 0x4b8   : > { %v277_v2 = vadd.f32 %v276_v1, %v275_v0 }
 0x4ba   : > { %278 = vadd.xlane.f32.xlu1 %v277_v2 }
 0x547   : > { %v279_v3 = vpop.xlane.xlu1 %278 }
 0x548   : > { %484 = vrcp.f32 %v279_v3 }
 0x552   : > { %v485_v4 = vpop.eup %484 }
 0x553   : > { %v282_v5 = vmul.f32 %v485_v4, %v275_v0  ;;  %v283_v6 = vmul.f32 %v485_v4, %v276_v1 }
 0x555   : > { %v284_v7 = vadd.f32 %v282_v5, %v262_v56  ;;  %v285_v8 = vadd.f32 %v283_v6, %v263_v53 }
 0x557   : > { %286 = vst [vmem:[%s197_s7] sm:$0xff] %v284_v7  ;;  %287 = vst [vmem:[%s197_s7 + $0x8] sm:$0xff] %v285_v8 }
 0x558   : > { %559 = shalt.err (!%p556_p1)
}
 0x559   : > { %s560_s25 = scalar_lea.hbm %s806_s16, 256  ;;  %s564_s5 = scalar_lea.hbm %s852_s2, 512 }
 0x55a   : > { %p561_p11 = scmp.ne.s32.totalorder %s806_s16, %s560_s25  ;;  %p565_p4 = scmp.lt.u32.totalorder %s806_s16, %s852_s2 }
 0x55b   : > { %p566_p10 = scmp.lt.u32.totalorder %s564_s5, %s560_s25  ;;  %p568_p13 = scmp.lt.u32.totalorder %s560_s25, %s806_s16 }
 0x55c   : > { %p562_p12 = pnand %p561_p11, %p865_p3 }
 0x55d   : > { %p567_p6 = por %p566_p10, %p565_p4 }
 0x55e   : > { %p563_p2 = pneg %p562_p12 }
 0x55f   : > { %p569_p7 = por %p568_p13, %p567_p6 }
 0x561   : > { %p570_p5 = pnand %p569_p7, %p563_p2 }
 0x563   : > { %573 = shalt.err (!%p570_p5)
}
 0x564   : > { %421 = dma.vmem_to_hbm [thread:$0]  (%p865_p3), %s808_s14, 256, %s806_s16, %s289_s24  }
 0x565 PF: > { %s315_s30 = sand.u32 1, %s604_s9   ;;  %p866_p8 = scmp.ne.s32.totalorder %s858_s22, 0 }
 0x566   : > { %p867_p9 = scmp.ge.s32.totalorder %s616_s12, 2  ;;  %s316_s3 = scalar_lea.sflag [#allocation4], %s315_s30 }
 0x568   : > { %p431_p0 = pnand %p867_p9, %p866_p8 }
 0x56a   : > { %599 = dma.done.wait (!%p431_p0), %s316_s3, 256  }
 0x56b   : > { %601 = vsyncadd (!%p431_p0), %s316_s3, 4294967040  ;;  %p18_p1 = scmp.ge.s32.totalorder %s661_s15, 4   ;;  %s868_s9 = smov %s608_s10 }
 0x56c   : > { %s869_s10 = smov %s612_s11  ;;  %s870_s11 = smov %s673_s18 }
 0x56d   : > { %s871_s12 = smov %s661_s15  ;;  %20 = sbr.rel (!%p18_p1) target bundleno = 7 (0x7), region = 86 }
 0x574   :  { %321 = vsyncpa [#allocation3], 1 }
 0x575   :  { %323 = vsyncpa [#allocation3 + $0x1], 1 }
 0x576   :  { %324 = vsyncpa [#allocation6], 1 }
 0x577   :  { %326 = vsyncpa [#allocation6 + $0x1], 1 }
 0x578   :  { %327 = vsyncpa [#allocation4], 1 }
 0x579   :  { %329 = vsyncpa [#allocation4 + $0x1], 1 }

</bundles_post_ra>
